<compile_context>
chip_gen: v7x
topology: tpu7x:2x2x1
jax: 0.10.0
libtpu: 0.0.40
codegen_flags: <defaults>
</compile_context>

<pallas_src>
import functools

import jax
import jax.numpy as jnp
from jax.experimental import pallas as pl
from jax.experimental.pallas import tpu as pltpu


def _context_fm_kernel(e_ref, lin_ref, bias_ref, out_ref, *, num_fields):
    """One batch tile.

    e_ref   : (F, F, D, TB) VMEM  e_ref[i, f, :, b] = emb_i[x[b, f]]   (lane axis = batch)
    lin_ref : (F, TB)       VMEM  lin_ref[f, b]     = fc[x[b, f]]
    bias_ref: (1,)          SMEM  linear bias
    out_ref : (1, TB)       VMEM  sigmoid scores
    """
    d = e_ref.shape[2]
    tb = e_ref.shape[3]

    # Accumulate every pairwise product on the VPU; reduce over the embedding dim only once
    # at the end (a single XLU sublane-reduce instead of one per pair).
    acc = jnp.zeros((d, tb), jnp.float32)
    # NOTE: fully unrolled Python double loop is fine for small F; for large F restructure as
    # a fori_loop over a precomputed pair list to avoid quadratic code-size blowup.
    for i in range(num_fields - 1):
        for j in range(i + 1, num_fields):
            a = e_ref[j, i, :, :].astype(jnp.float32)   # xs[j][:, i]  laid out as (D, TB)
            b = e_ref[i, j, :, :].astype(jnp.float32)   # xs[i][:, j]  laid out as (D, TB)
            acc = acc + a * b

    ffm_term = jnp.sum(acc, axis=0)                               # (TB,)
    lin_sum = jnp.sum(lin_ref[...].astype(jnp.float32), axis=0)   # (TB,)
    out_ref[0, :] = jax.nn.sigmoid(lin_sum + bias_ref[0] + ffm_term)


def context_fm_forward(x_idx, emb_weights, fc_weight, bias, *, tb=1024):
    """x_idx: (B, F) int32; emb_weights: (F, V, D); fc_weight: (V, 1); bias: (1,)."""
    B, F = x_idx.shape
    D = emb_weights.shape[-1]

    # Batch tile: lane-aligned (multiple of 128) or covering the whole (possibly small) batch.
    tb = min(tb, B)
    assert tb % 128 == 0 or tb == B, "batch tile must be a multiple of 128 or cover the batch"
    n_blocks = pl.cdiv(B, tb)
    Bp = n_blocks * tb
    if Bp != B:
        pad = jnp.zeros((Bp - B, F), x_idx.dtype)      # pad with index 0; sliced off below
        x_use = jnp.concatenate([x_idx, pad], axis=0)
    else:
        x_use = x_idx

    # Glue: embedding gathers (pure memory indexing) + lane-dense transpose (batch last).
    e = emb_weights[:, x_use, :]              # (F, Bp, F, D)   e[i, b, f, :] = emb_i[x[b, f]]
    e = jnp.transpose(e, (0, 2, 3, 1))        # (F, F, D, Bp)   batch on the lane axis
    lin = fc_weight[x_use, 0].T               # (F, Bp)

    out = pl.pallas_call(
        functools.partial(_context_fm_kernel, num_fields=F),
        out_shape=jax.ShapeDtypeStruct((1, Bp), jnp.float32),
        grid=(n_blocks,),
        in_specs=[
            pl.BlockSpec((F, F, D, tb), lambda b: (0, 0, 0, b)),
            pl.BlockSpec((F, tb), lambda b: (0, b)),
            pl.BlockSpec(memory_space=pltpu.MemorySpace.SMEM),
        ],
        out_specs=pl.BlockSpec((1, tb), lambda b: (0, b)),
        compiler_params=pltpu.CompilerParams(
            dimension_semantics=("parallel",)),
    )(e, lin, bias)
    return out[0, :B]


def _ref_forward(x_idx, emb_weights, fc_weight, bias):
    """Pure-JAX reference mirroring the PyTorch module."""
    F = x_idx.shape[1]
    xs = [emb_weights[i][x_idx] for i in range(F)]   # each (B, F, D)
    ix = []
    for i in range(F - 1):
        for j in range(i + 1, F):
            ix.append(xs[j][:, i] * xs[i][:, j])
    ix = jnp.stack(ix, axis=1)                       # (B, P, D)
    ffm_term = jnp.sum(ix, axis=(1, 2))              # (B,)
    lin = jnp.sum(fc_weight[x_idx, 0], axis=1) + bias[0]
    return jax.nn.sigmoid(lin + ffm_term)


if __name__ == "__main__":
    key = jax.random.PRNGKey(0)
    field_dims = [5, 7, 3, 4]          # small synthetic field sizes
    embed_dim = 32
    vocab = sum(field_dims)
    num_fields = len(field_dims)

    k_emb, k_fc, k_x1, k_x2 = jax.random.split(key, 4)

    # Deterministic parameter init (xavier_uniform for FFM embeddings, as in __init__).
    xavier_bound = (6.0 / (vocab + embed_dim)) ** 0.5
    emb_weights = jax.random.uniform(
        k_emb, (num_fields, vocab, embed_dim), jnp.float32,
        minval=-xavier_bound, maxval=xavier_bound)
    fc_weight = jax.random.normal(k_fc, (vocab, 1), jnp.float32)  # Embedding default ~ N(0,1)
    bias = jnp.zeros((1,), jnp.float32)

    # Case 1: tiny batch (single block that covers the whole batch).
    batch1 = 8
    x1 = jax.random.randint(k_x1, (batch1, num_fields), 0, vocab, dtype=jnp.int32)
    out1 = context_fm_forward(x1, emb_weights, fc_weight, bias)
    jax.block_until_ready(out1)
    ref1 = _ref_forward(x1, emb_weights, fc_weight, bias)
    assert out1.shape == (batch1,)
    assert jnp.allclose(out1, ref1, atol=1e-5, rtol=1e-5), (out1, ref1)

    # Case 2: multi-tile batch with a remainder (exercises grid>1, padding, output slice).
    batch2 = 300
    x2 = jax.random.randint(k_x2, (batch2, num_fields), 0, vocab, dtype=jnp.int32)
    out2 = context_fm_forward(x2, emb_weights, fc_weight, bias, tb=128)
    jax.block_until_ready(out2)
    ref2 = _ref_forward(x2, emb_weights, fc_weight, bias)
    assert out2.shape == (batch2,)
    assert jnp.allclose(out2, ref2, atol=1e-5, rtol=1e-5), (out2, ref2)

    print("KERNEL_OK")
</pallas_src>

<mosaic_0001>
module attributes {stable_mosaic.version = 11 : i64} {
  func.func @_context_fm_kernel(%arg0: i32, %arg1: memref<4x4x32x8xf32, #tpu.memory_space<vmem>>, %arg2: memref<4x8xf32, #tpu.memory_space<vmem>>, %arg3: memref<1xf32, #tpu.memory_space<smem>>, %arg4: memref<1x8xf32, #tpu.memory_space<vmem>>) attributes {dimension_semantics = [#tpu.dimension_semantics<parallel>], iteration_bounds = array<i64: 1>, scalar_prefetch = 0 : i64, scratch_operands = 0 : i64, tpu.core_type = #tpu.core_type<tc>, window_params = [{transform_indices = @transform_0, window_bounds = array<i64: 4, 4, 32, 8>}, {transform_indices = @transform_1, window_bounds = array<i64: 4, 8>}, {transform_indices = @transform_2, window_bounds = array<i64: 1>}, {transform_indices = @transform_3, window_bounds = array<i64: 1, 8>}]} {
    %cst = arith.constant 0.000000e+00 : f32
    %0 = vector.broadcast %cst : f32 to vector<32x8xf32>
    %c1 = arith.constant 1 : index
    %c0 = arith.constant 0 : index
    %c0_0 = arith.constant 0 : index
    %c0_1 = arith.constant 0 : index
    %1 = vector.load %arg1[%c1, %c0, %c0_0, %c0_1] : memref<4x4x32x8xf32, #tpu.memory_space<vmem>>, vector<1x1x32x8xf32>
    %2 = vector.shape_cast %1 : vector<1x1x32x8xf32> to vector<32x8xf32>
    %c0_2 = arith.constant 0 : index
    %c1_3 = arith.constant 1 : index
    %c0_4 = arith.constant 0 : index
    %c0_5 = arith.constant 0 : index
    %3 = vector.load %arg1[%c0_2, %c1_3, %c0_4, %c0_5] : memref<4x4x32x8xf32, #tpu.memory_space<vmem>>, vector<1x1x32x8xf32>
    %4 = vector.shape_cast %3 : vector<1x1x32x8xf32> to vector<32x8xf32>
    %5 = arith.mulf %2, %4 : vector<32x8xf32>
    %6 = arith.addf %0, %5 : vector<32x8xf32>
    %c2 = arith.constant 2 : index
    %c0_6 = arith.constant 0 : index
    %c0_7 = arith.constant 0 : index
    %c0_8 = arith.constant 0 : index
    %7 = vector.load %arg1[%c2, %c0_6, %c0_7, %c0_8] : memref<4x4x32x8xf32, #tpu.memory_space<vmem>>, vector<1x1x32x8xf32>
    %8 = vector.shape_cast %7 : vector<1x1x32x8xf32> to vector<32x8xf32>
    %c0_9 = arith.constant 0 : index
    %c2_10 = arith.constant 2 : index
    %c0_11 = arith.constant 0 : index
    %c0_12 = arith.constant 0 : index
    %9 = vector.load %arg1[%c0_9, %c2_10, %c0_11, %c0_12] : memref<4x4x32x8xf32, #tpu.memory_space<vmem>>, vector<1x1x32x8xf32>
    %10 = vector.shape_cast %9 : vector<1x1x32x8xf32> to vector<32x8xf32>
    %11 = arith.mulf %8, %10 : vector<32x8xf32>
    %12 = arith.addf %6, %11 : vector<32x8xf32>
    %c3 = arith.constant 3 : index
    %c0_13 = arith.constant 0 : index
    %c0_14 = arith.constant 0 : index
    %c0_15 = arith.constant 0 : index
    %13 = vector.load %arg1[%c3, %c0_13, %c0_14, %c0_15] : memref<4x4x32x8xf32, #tpu.memory_space<vmem>>, vector<1x1x32x8xf32>
    %14 = vector.shape_cast %13 : vector<1x1x32x8xf32> to vector<32x8xf32>
    %c0_16 = arith.constant 0 : index
    %c3_17 = arith.constant 3 : index
    %c0_18 = arith.constant 0 : index
    %c0_19 = arith.constant 0 : index
    %15 = vector.load %arg1[%c0_16, %c3_17, %c0_18, %c0_19] : memref<4x4x32x8xf32, #tpu.memory_space<vmem>>, vector<1x1x32x8xf32>
    %16 = vector.shape_cast %15 : vector<1x1x32x8xf32> to vector<32x8xf32>
    %17 = arith.mulf %14, %16 : vector<32x8xf32>
    %18 = arith.addf %12, %17 : vector<32x8xf32>
    %c2_20 = arith.constant 2 : index
    %c1_21 = arith.constant 1 : index
    %c0_22 = arith.constant 0 : index
    %c0_23 = arith.constant 0 : index
    %19 = vector.load %arg1[%c2_20, %c1_21, %c0_22, %c0_23] : memref<4x4x32x8xf32, #tpu.memory_space<vmem>>, vector<1x1x32x8xf32>
    %20 = vector.shape_cast %19 : vector<1x1x32x8xf32> to vector<32x8xf32>
    %c1_24 = arith.constant 1 : index
    %c2_25 = arith.constant 2 : index
    %c0_26 = arith.constant 0 : index
    %c0_27 = arith.constant 0 : index
    %21 = vector.load %arg1[%c1_24, %c2_25, %c0_26, %c0_27] : memref<4x4x32x8xf32, #tpu.memory_space<vmem>>, vector<1x1x32x8xf32>
    %22 = vector.shape_cast %21 : vector<1x1x32x8xf32> to vector<32x8xf32>
    %23 = arith.mulf %20, %22 : vector<32x8xf32>
    %24 = arith.addf %18, %23 : vector<32x8xf32>
    %c3_28 = arith.constant 3 : index
    %c1_29 = arith.constant 1 : index
    %c0_30 = arith.constant 0 : index
    %c0_31 = arith.constant 0 : index
    %25 = vector.load %arg1[%c3_28, %c1_29, %c0_30, %c0_31] : memref<4x4x32x8xf32, #tpu.memory_space<vmem>>, vector<1x1x32x8xf32>
    %26 = vector.shape_cast %25 : vector<1x1x32x8xf32> to vector<32x8xf32>
    %c1_32 = arith.constant 1 : index
    %c3_33 = arith.constant 3 : index
    %c0_34 = arith.constant 0 : index
    %c0_35 = arith.constant 0 : index
    %27 = vector.load %arg1[%c1_32, %c3_33, %c0_34, %c0_35] : memref<4x4x32x8xf32, #tpu.memory_space<vmem>>, vector<1x1x32x8xf32>
    %28 = vector.shape_cast %27 : vector<1x1x32x8xf32> to vector<32x8xf32>
    %29 = arith.mulf %26, %28 : vector<32x8xf32>
    %30 = arith.addf %24, %29 : vector<32x8xf32>
    %c3_36 = arith.constant 3 : index
    %c2_37 = arith.constant 2 : index
    %c0_38 = arith.constant 0 : index
    %c0_39 = arith.constant 0 : index
    %31 = vector.load %arg1[%c3_36, %c2_37, %c0_38, %c0_39] : memref<4x4x32x8xf32, #tpu.memory_space<vmem>>, vector<1x1x32x8xf32>
    %32 = vector.shape_cast %31 : vector<1x1x32x8xf32> to vector<32x8xf32>
    %c2_40 = arith.constant 2 : index
    %c3_41 = arith.constant 3 : index
    %c0_42 = arith.constant 0 : index
    %c0_43 = arith.constant 0 : index
    %33 = vector.load %arg1[%c2_40, %c3_41, %c0_42, %c0_43] : memref<4x4x32x8xf32, #tpu.memory_space<vmem>>, vector<1x1x32x8xf32>
    %34 = vector.shape_cast %33 : vector<1x1x32x8xf32> to vector<32x8xf32>
    %35 = arith.mulf %32, %34 : vector<32x8xf32>
    %36 = arith.addf %30, %35 : vector<32x8xf32>
    %cst_44 = arith.constant dense<0.000000e+00> : vector<8xf32>
    %37 = vector.multi_reduction <add>, %36, %cst_44 [0] : vector<32x8xf32> to vector<8xf32>
    %c0_45 = arith.constant 0 : index
    %c0_46 = arith.constant 0 : index
    %38 = vector.load %arg2[%c0_45, %c0_46] : memref<4x8xf32, #tpu.memory_space<vmem>>, vector<4x8xf32>
    %cst_47 = arith.constant dense<0.000000e+00> : vector<8xf32>
    %39 = vector.multi_reduction <add>, %38, %cst_47 [0] : vector<4x8xf32> to vector<8xf32>
    %c0_48 = arith.constant 0 : index
    %40 = memref.load %arg3[%c0_48] : memref<1xf32, #tpu.memory_space<smem>>
    %41 = vector.broadcast %40 : f32 to vector<8xf32>
    %42 = arith.addf %39, %41 : vector<8xf32>
    %43 = arith.addf %42, %37 : vector<8xf32>
    %44 = arith.negf %43 : vector<8xf32>
    %45 = math.exp %44 : vector<8xf32>
    %cst_49 = arith.constant 1.000000e+00 : f32
    %46 = vector.broadcast %cst_49 : f32 to vector<8xf32>
    %47 = arith.addf %46, %45 : vector<8xf32>
    %48 = arith.divf %46, %47 : vector<8xf32>
    %c0_50 = arith.constant 0 : index
    %c0_51 = arith.constant 0 : index
    %49 = vector.load %arg4[%c0_50, %c0_51] : memref<1x8xf32, #tpu.memory_space<vmem>>, vector<1x8xf32>
    %50 = vector.shape_cast %49 : vector<1x8xf32> to vector<8xf32>
    %51 = vector.shape_cast %48 : vector<8xf32> to vector<1x8xf32>
    tpu.vector_store %arg4[%c0_50, %c0_51], %51 {strides = array<i32>} : memref<1x8xf32, #tpu.memory_space<vmem>>, vector<1x8xf32>,
    return
  }
  func.func @transform_0(%arg0: i32) -> (i32, i32, i32, i32) {
    %c0_i32 = arith.constant 0 : i32
    %c0_i32_0 = arith.constant 0 : i32
    %c0_i32_1 = arith.constant 0 : i32
    %c0_i32_2 = arith.constant 0 : i32
    return %c0_i32, %c0_i32_0, %c0_i32_1, %arg0 : i32, i32, i32, i32
  }
  func.func @transform_1(%arg0: i32) -> (i32, i32) {
    %c0_i32 = arith.constant 0 : i32
    %c0_i32_0 = arith.constant 0 : i32
    return %c0_i32, %arg0 : i32, i32
  }
  func.func @transform_2(%arg0: i32) -> i32 {
    %c0_i32 = arith.constant 0 : i32
    %c0_i32_0 = arith.constant 0 : i32
    return %c0_i32 : i32
  }
  func.func @transform_3(%arg0: i32) -> (i32, i32) {
    %c0_i32 = arith.constant 0 : i32
    %c0_i32_0 = arith.constant 0 : i32
    return %c0_i32, %arg0 : i32, i32
  }
}

</mosaic_0001>

<bundles_post_ra>
// kernel: tpu_custom_call.1
= control target key start
LH: loop header
LB: loop body
LE: loop exit
PB: predicated region body
PF: predicated region fallthrough
CT: control target
= control target key end

     0   :  { %9 = vsyncpa [#allocation4], 0  ;;  %vm139_vm0 = vcmask 60416   ;;  %vm124_vm1 = vcmask 64512   ;;  %s251_s29 = smov [#allocation3]   ;;  %vm157_vm2 = vcmask 57344   ;;  %s434_s0 = inlined_call_operand.vmem [shape: f32[4,4,32,8], index: 0, kind: input, shape index: {}]   ;;  %s435_s1 = inlined_call_operand.vmem [shape: f32[4,8], index: 1, kind: input, shape index: {}]   ;;  %s436_s2 = inlined_call_operand.<no memory space> [shape: f32[1], index: 2, kind: input, shape index: {}]   ;;  %s437_s3 = inlined_call_operand.hbm [shape: f32[1,8], index: 3, kind: output, shape index: {}]  }
   0x1   :  { %v173_v0 = vld [vmem:[%s434_s0 + $0x80] sm:$0xff]  ;;  %v174_v1 = vld [vmem:[%s434_s0 + $0x88] sm:$0xff]  ;;  %v175_v2 = vld [vmem:[%s434_s0 + $0x90] sm:$0xff]  ;;  %s165_s30 = sshll.u32 %s251_s29, 4  ;;  %s166_s30 = int_to_ptr.vmem [resolvable:$true] %s165_s30 }
   0x2   :  { %v176_v3 = vld [vmem:[%s434_s0 + $0x98] sm:$0xff]  ;;  %v177_v4 = vld [vmem:[%s434_s0 + $0x20] sm:$0xff]  ;;  %v178_v5 = vld [vmem:[%s434_s0 + $0x28] sm:$0xff]  ;;  %s227_s4 = scalar_lea.vmem %s166_s30, 16  ;;  %s231_s5 = scalar_lea.vmem %s166_s30, 32 }
   0x3   :  { %v179_v6 = vld [vmem:[%s434_s0 + $0x30] sm:$0xff]  ;;  %v180_v7 = vld [vmem:[%s434_s0 + $0x38] sm:$0xff]  ;;  %v26_v8 = vmul.f32 %v177_v4, %v173_v0  ;;  %v27_v9 = vmul.f32 %v178_v5, %v174_v1  ;;  %v181_v10 = vld [vmem:[%s434_s0 + $0x100] sm:$0xff]  ;;  %p228_p0 = scmp.ne.s32.totalorder %s166_s30, %s227_s4  ;;  %p232_p1 = scmp.lt.s32.totalorder %s166_s30, %s166_s30 }
   0x4   :  { %v182_v11 = vld [vmem:[%s434_s0 + $0x108] sm:$0xff]  ;;  %v183_v12 = vld [vmem:[%s434_s0 + $0x110] sm:$0xff]  ;;  %v28_v13 = vmul.f32 %v179_v6, %v175_v2  ;;  %v29_v14 = vmul.f32 %v180_v7, %v176_v3  ;;  %v184_v15 = vld [vmem:[%s434_s0 + $0x118] sm:$0xff]  ;;  %p233_p2 = scmp.lt.s32.totalorder %s231_s5, %s227_s4 }
   0x5   :  { %v185_v16 = vld [vmem:[%s434_s0 + $0x40] sm:$0xff]  ;;  %v186_v17 = vld [vmem:[%s434_s0 + $0x48] sm:$0xff]  ;;  %v187_v18 = vld [vmem:[%s434_s0 + $0x50] sm:$0xff] }
   0x6   :  { %v188_v19 = vld [vmem:[%s434_s0 + $0x58] sm:$0xff]  ;;  %v44_v20 = vmul.f32 %v185_v16, %v181_v10  ;;  %v45_v21 = vmul.f32 %v186_v17, %v182_v11  ;;  %v189_v22 = vld [vmem:[%s434_s0 + $0x180] sm:$0xff]  ;;  %v46_v23 = vmul.f32 %v187_v18, %v183_v12  ;;  %v190_v25 = vld [vmem:[%s434_s0 + $0x188] sm:$0xff]  ;;  %p234_p3 = por %p233_p2, %p232_p1 }
   0x7   :  { %v47_v24 = vmul.f32 %v188_v19, %v184_v15  ;;  %v191_v26 = vld [vmem:[%s434_s0 + $0x190] sm:$0xff]  ;;  %v192_v27 = vld [vmem:[%s434_s0 + $0x198] sm:$0xff]  ;;  %v193_v30 = vld [vmem:[%s434_s0 + $0x60] sm:$0xff] }
   0x8   :  { %v48_v28 = vadd.f32 %v44_v20, %v26_v8  ;;  %v49_v29 = vadd.f32 %v45_v21, %v27_v9  ;;  %v194_v31 = vld [vmem:[%s434_s0 + $0x68] sm:$0xff]  ;;  %v195_v32 = vld [vmem:[%s434_s0 + $0x70] sm:$0xff]  ;;  %v50_v33 = vadd.f32 %v46_v23, %v28_v13  ;;  %v196_v35 = vld [vmem:[%s434_s0 + $0x78] sm:$0xff]  ;;  %v62_v36 = vmul.f32 %v193_v30, %v189_v22  ;;  %p235_p4 = pnand %p234_p3, %p228_p0 }
   0x9   :  { %v51_v34 = vadd.f32 %v47_v24, %v29_v14  ;;  %v63_v37 = vmul.f32 %v194_v31, %v190_v25  ;;  %v197_v38 = vld [vmem:[%s434_s0 + $0x120] sm:$0xff]  ;;  %v198_v39 = vld [vmem:[%s434_s0 + $0x128] sm:$0xff]  ;;  %v64_v40 = vmul.f32 %v195_v32, %v191_v26  ;;  %v65_v41 = vmul.f32 %v196_v35, %v192_v27  ;;  %v199_v42 = vld [vmem:[%s434_s0 + $0x130] sm:$0xff] }
   0xa   :  { %v200_v43 = vld [vmem:[%s434_s0 + $0x138] sm:$0xff]  ;;  %v201_v44 = vld [vmem:[%s434_s0 + $0xc0] sm:$0xff]  ;;  %v66_v45 = vadd.f32 %v62_v36, %v48_v28  ;;  %v202_v47 = vld [vmem:[%s434_s0 + $0xc8] sm:$0xff] }
   0xb   :  { %v67_v46 = vadd.f32 %v63_v37, %v49_v29  ;;  %v203_v48 = vld [vmem:[%s434_s0 + $0xd0] sm:$0xff]  ;;  %v204_v49 = vld [vmem:[%s434_s0 + $0xd8] sm:$0xff]  ;;  %v80_v50 = vmul.f32 %v201_v44, %v197_v38  ;;  %v68_v51 = vadd.f32 %v64_v40, %v50_v33  ;;  %v69_v52 = vadd.f32 %v65_v41, %v51_v34  ;;  %v205_v55 = vld [vmem:[%s434_s0 + $0x1a0] sm:$0xff] }
   0xc   :  { %v81_v53 = vmul.f32 %v202_v47, %v198_v39  ;;  %v82_v54 = vmul.f32 %v203_v48, %v199_v42  ;;  %v206_v56 = vld [vmem:[%s434_s0 + $0x1a8] sm:$0xff]  ;;  %v207_v57 = vld [vmem:[%s434_s0 + $0x1b0] sm:$0xff]  ;;  %v83_v58 = vmul.f32 %v204_v49, %v200_v43  ;;  %v208_v60 = vld [vmem:[%s434_s0 + $0x1b8] sm:$0xff] }
   0xd   :  { %v84_v59 = vadd.f32 %v80_v50, %v66_v45  ;;  %v209_v61 = vld [vmem:[%s434_s0 + $0xe0] sm:$0xff]  ;;  %v210_v62 = vld [vmem:[%s434_s0 + $0xe8] sm:$0xff]  ;;  %v211_v1 = vld [vmem:[%s434_s0 + $0xf0] sm:$0xff] }
   0xe   :  { %v85_v63 = vadd.f32 %v81_v53, %v67_v46  ;;  %v86_v0 = vadd.f32 %v82_v54, %v68_v51  ;;  %v212_v2 = vld [vmem:[%s434_s0 + $0xf8] sm:$0xff]  ;;  %v98_v3 = vmul.f32 %v209_v61, %v205_v55  ;;  %v99_v4 = vmul.f32 %v210_v62, %v206_v56  ;;  %v213_v5 = vld [vmem:[%s434_s0 + $0x1c0] sm:$0xff]  ;;  %v214_v9 = vld [vmem:[%s434_s0 + $0x1c8] sm:$0xff] }
   0xf   :  { %v87_v6 = vadd.f32 %v83_v58, %v69_v52  ;;  %v100_v7 = vmul.f32 %v211_v1, %v207_v57  ;;  %v101_v8 = vmul.f32 %v212_v2, %v208_v60  ;;  %v215_v10 = vld [vmem:[%s434_s0 + $0x1d0] sm:$0xff]  ;;  %v216_v11 = vld [vmem:[%s434_s0 + $0x1d8] sm:$0xff]  ;;  %v217_v14 = vld [vmem:[%s434_s0 + $0x160] sm:$0xff]  ;;  %v148_v46 = vstv %s436_s2 }
  0x10   :  { %v102_v12 = vadd.f32 %v98_v3, %v84_v59  ;;  %v103_v13 = vadd.f32 %v99_v4, %v85_v63  ;;  %v218_v15 = vld [vmem:[%s434_s0 + $0x168] sm:$0xff]  ;;  %v219_v16 = vld [vmem:[%s434_s0 + $0x170] sm:$0xff]  ;;  %v220_v19 = vld [vmem:[%s434_s0 + $0x178] sm:$0xff]  ;;  %v116_v20 = vmul.f32 %v217_v14, %v213_v5 }
  0x11   :  { %v104_v17 = vadd.f32 %v100_v7, %v86_v0  ;;  %v105_v18 = vadd.f32 %v101_v8, %v87_v6  ;;  %v117_v21 = vmul.f32 %v218_v15, %v214_v9  ;;  %v138_v22 = vld [vmem:[%s435_s1] sm:$0xf]  ;;  %v118_v23 = vmul.f32 %v219_v16, %v215_v10 }
  0x12   :  { %v119_v24 = vmul.f32 %v220_v19, %v216_v11  ;;  %v140_v25 = vsel %vm139_vm0, %v138_v22, 0.0  ;;  %v120_v26 = vadd.f32 %v116_v20, %v102_v12 }
  0x13   :  { %v121_v27 = vadd.f32 %v117_v21, %v103_v13  ;;  %v141_v28 = vrot.slane %v140_v25, 4  ;;  %v122_v29 = vadd.f32 %v118_v23, %v104_v17 }
  0x14   :  { %v123_v30 = vadd.f32 %v119_v24, %v105_v18  ;;  %v125_v31 = vsel %vm124_vm1, %v120_v26, 0.0 }
  0x15   :  { %v126_v32 = vsel %vm124_vm1, %v121_v27, 0.0  ;;  %v142_v33 = vadd.f32 %v141_v28, %v140_v25  ;;  %v128_v35 = vsel %vm124_vm1, %v122_v29, 0.0 }
  0x16   :  { %v127_v34 = vadd.f32 %v126_v32, %v125_v31  ;;  %v130_v36 = vsel %vm124_vm1, %v123_v30, 0.0 }
  0x17   :  { %v143_v37 = vrot.slane %v142_v33, 2 }
  0x18   :  { %v129_v38 = vadd.f32 %v128_v35, %v127_v34 }
  0x19   :  { %v144_v39 = vadd.f32 %v143_v37, %v142_v33 }
  0x1a   :  { %v131_v40 = vadd.f32 %v130_v36, %v129_v38 }
  0x1b   :  { %v145_v42 = vrot.slane %v144_v39, 1 }
  0x1c   :  { %v132_v41 = vrot.slane %v131_v40, 4 }
  0x1d   :  { %v146_v45 = vadd.f32 %v145_v42, %v144_v39 }
  0x1e   :  { %v133_v43 = vadd.f32 %v132_v41, %v131_v40 }
  0x1f   :  { %v149_v49 = vadd.f32 %v148_v46, %v146_v45 }
  0x20   :  { %v134_v44 = vrot.slane %v133_v43, 2 }
  0x22   :  { %v135_v47 = vadd.f32 %v134_v44, %v133_v43 }
  0x24   :  { %v136_v48 = vrot.slane %v135_v47, 1 }
  0x26   :  { %v137_v50 = vadd.f32 %v136_v48, %v135_v47 }
  0x28   :  { %v150_v51 = vadd.f32 %v149_v49, %v137_v50 }
  0x2a   :  { %v221_v52 = vmul.f32 -1.442695, %v150_v51 }
  0x2c   :  { %223 = vpow2.f32 %v221_v52 }
  0x36   :  { %v224_v53 = vpop.eup %223 }
  0x37   :  { %v154_v54 = vadd.f32 1.0, %v224_v53 }
  0x39   :  { %225 = vrcp.f32 %v154_v54 }
  0x43   :  { %v226_v55 = vpop.eup %225 }
  0x44   :  { %158 = vst.msk [vmem:[#allocation3] sm:$0x1] %vm157_vm2, %v226_v55 }
  0x45   :  { %238 = shalt.err (!%p235_p4)
}
  0x46   :  { %s239_s7 = scalar_lea.hbm %s437_s3, 16 }
  0x47   :  { %p240_p5 = scmp.ne.s32.totalorder %s437_s3, %s239_s7  ;;  %p243_p6 = scmp.lt.u32.totalorder %s239_s7, %s437_s3 }
  0x49   :  { %p245_p7 = pnand %p243_p6, %p240_p5 }
  0x4b   :  { %248 = shalt.err (!%p245_p7)
}
  0x4c   :  { %168 = dma.vmem_to_hbm [thread:$0]  %s166_s30, 16, %s437_s3, [#allocation4]  }
  0x4d   :  { %249 = dma.done.wait [#allocation4], 16  }
  0x4e   :  { %250 = vsyncadd [#allocation4], 4294967280 }
  0x4f   :  { %172 = vsyncpa [#allocation4], 1 }

</bundles_post_ra>
